<compile_context>
chip_gen: v7x
topology: tpu7x:2x2x1
jax: 0.10.0
libtpu: 0.0.40
codegen_flags: <defaults>
</compile_context>

<pallas_src>
import math

import jax
import jax.numpy as jnp
from jax.experimental import pallas as pl
from jax.experimental.pallas import tpu as pltpu


def make_positional_encoding(max_len: int, d_model: int) -> jax.Array:
    """Deterministic buffer construction (mirrors the PyTorch __init__)."""
    position = jnp.arange(max_len, dtype=jnp.float32)[:, None]             # (L, 1)
    div_term = jnp.exp(
        jnp.arange(0, d_model, 2, dtype=jnp.float32)
        * (-math.log(10000.0) / d_model)
    )                                                                      # (D/2,)
    pe = jnp.zeros((max_len, d_model), dtype=jnp.float32)
    pe = pe.at[:, 0::2].set(jnp.sin(position * div_term))
    pe = pe.at[:, 1::2].set(jnp.cos(position * div_term))
    # unsqueeze(0).transpose(0, 1) -> (max_len, 1, d_model)
    return pe[None, :, :].transpose(1, 0, 2)


def _make_kernel(threshold: int, scale: float, apply_dropout: bool):
    """Elementwise kernel on lane-dense (TS, B*D) tiles."""
    if apply_dropout:
        def kernel(x_ref, pe_ref, bits_ref, o_ref):
            y = x_ref[...] + pe_ref[...]
            # Inverted dropout: keep with prob (1-p), scale kept values by 1/(1-p).
            # bits are uniform int32 in [0, 2^31); integer compare only (no float conv).
            keep = bits_ref[...] >= jnp.int32(threshold)
            y = jnp.where(keep, y * jnp.asarray(scale, y.dtype),
                          jnp.asarray(0, y.dtype))
            o_ref[...] = y.astype(o_ref.dtype)
    else:
        def kernel(x_ref, pe_ref, o_ref):
            o_ref[...] = (x_ref[...] + pe_ref[...]).astype(o_ref.dtype)
    return kernel


def _pick_tile_rows(n_rows: int, row_bytes: int, target_bytes: int = 1 << 20) -> int:
    """Multiple-of-8 row count that divides n_rows, ~target_bytes per buffer."""
    if n_rows <= 8:
        return n_rows
    max_rows = max(8, min(n_rows, target_bytes // max(row_bytes, 1)))
    max_rows = (max_rows // 8) * 8
    for ts in range(max_rows, 7, -8):
        if n_rows % ts == 0:
            return ts
    return n_rows  # fallback: single full block (always legal)


def positional_encoding_forward(x, pe, key, *, p: float = 0.1, train: bool = True):
    """x: [S, B, D]; pe: [max_len, 1, D]; key: jax PRNG key for the dropout mask."""
    S, B, D = x.shape
    apply_dropout = bool(train) and p > 0.0

    # Lane-dense 2D views (wrapper-side layout plumbing only).
    x2 = x.reshape(S, B * D)
    pe2 = jnp.tile(pe[:S, 0, :].astype(x.dtype), (1, B))          # (S, B*D)

    ts = _pick_tile_rows(S, B * D * x.dtype.itemsize)
    grid = (S // ts,)
    spec = pl.BlockSpec((ts, B * D), lambda i: (i, 0))

    threshold = min(int(round(p * 2.0 ** 31)), (1 << 31) - 1)
    scale = 1.0 / (1.0 - p) if p < 1.0 else 0.0
    kernel = _make_kernel(threshold, scale, apply_dropout)

    args = [x2, pe2]
    in_specs = [spec, spec]
    if apply_dropout:
        # Uniform int32 in [0, 2^31): top bit cleared so the in-kernel compare is signed.
        bits = (jax.random.bits(key, (S, B * D), dtype=jnp.uint32) >> 1).astype(jnp.int32)
        args.append(bits)
        in_specs.append(spec)

    out2 = pl.pallas_call(
        kernel,
        out_shape=jax.ShapeDtypeStruct((S, B * D), x.dtype),
        grid=grid,
        in_specs=in_specs,
        out_specs=spec,
        compiler_params=pltpu.CompilerParams(
            dimension_semantics=("parallel",),
        ),
    )(*args)
    return out2.reshape(S, B, D)


if __name__ == "__main__":
    # Small shapes consistent with the module: seq=8, batch=2, d_model=32.
    seq_len, batch, d_model = 8, 2, 32
    max_len = 64
    p = 0.1

    root = jax.random.PRNGKey(0)
    x_key, drop_key = jax.random.split(root)
    x = jax.random.normal(x_key, (seq_len, batch, d_model), dtype=jnp.float32)
    pe = make_positional_encoding(max_len, d_model)

    # Training-mode forward (stochastic inverted dropout).
    y_train = positional_encoding_forward(x, pe, drop_key, p=p, train=True)
    jax.block_until_ready(y_train)

    # Eval-mode forward (dropout is identity) — check against the pure-JAX reference.
    y_eval = positional_encoding_forward(x, pe, drop_key, p=p, train=False)
    jax.block_until_ready(y_eval)

    y_ref = x + pe[:seq_len]
    assert y_train.shape == (seq_len, batch, d_model)
    assert jnp.allclose(y_eval, y_ref, atol=1e-6), "eval-mode mismatch vs reference"

    # Train-mode structural check: each element is either dropped (exact 0) or scaled.
    scaled = y_ref * (1.0 / (1.0 - p))
    ok = jnp.all((y_train == 0) | (jnp.abs(y_train - scaled) < 1e-5))
    assert bool(ok), "train-mode dropout structure mismatch"

    print("KERNEL_OK")
</pallas_src>

<mosaic_0001>
module attributes {stable_mosaic.version = 11 : i64} {
  func.func @kernel(%arg0: i32, %arg1: memref<8x64xf32, #tpu.memory_space<vmem>>, %arg2: memref<8x64xf32, #tpu.memory_space<vmem>>, %arg3: memref<8x64xi32, #tpu.memory_space<vmem>>, %arg4: memref<8x64xf32, #tpu.memory_space<vmem>>) attributes {dimension_semantics = [#tpu.dimension_semantics<parallel>], iteration_bounds = array<i64: 1>, scalar_prefetch = 0 : i64, scratch_operands = 0 : i64, tpu.core_type = #tpu.core_type<tc>, window_params = [{transform_indices = @transform_0, window_bounds = array<i64: 8, 64>}, {transform_indices = @transform_1, window_bounds = array<i64: 8, 64>}, {transform_indices = @transform_2, window_bounds = array<i64: 8, 64>}, {transform_indices = @transform_3, window_bounds = array<i64: 8, 64>}]} {
    %c0 = arith.constant 0 : index
    %c0_0 = arith.constant 0 : index
    %0 = vector.load %arg1[%c0, %c0_0] : memref<8x64xf32, #tpu.memory_space<vmem>>, vector<8x64xf32>
    %c0_1 = arith.constant 0 : index
    %c0_2 = arith.constant 0 : index
    %1 = vector.load %arg2[%c0_1, %c0_2] : memref<8x64xf32, #tpu.memory_space<vmem>>, vector<8x64xf32>
    %2 = arith.addf %0, %1 : vector<8x64xf32>
    %c0_3 = arith.constant 0 : index
    %c0_4 = arith.constant 0 : index
    %3 = vector.load %arg3[%c0_3, %c0_4] : memref<8x64xi32, #tpu.memory_space<vmem>>, vector<8x64xi32>
    %c214748365_i32 = arith.constant 214748365 : i32
    %4 = vector.broadcast %c214748365_i32 : i32 to vector<8x64xi32>
    %5 = arith.cmpi sge, %3, %4 : vector<8x64xi32>
    %cst = arith.constant 1.11111116 : f32
    %6 = vector.broadcast %cst : f32 to vector<8x64xf32>
    %7 = arith.mulf %2, %6 : vector<8x64xf32>
    %cst_5 = arith.constant 0.000000e+00 : f32
    %8 = vector.broadcast %cst_5 : f32 to vector<8x64xf32>
    %9 = arith.select %5, %7, %8 : vector<8x64xi1>, vector<8x64xf32>
    %c0_6 = arith.constant 0 : index
    %c0_7 = arith.constant 0 : index
    %10 = vector.load %arg4[%c0_6, %c0_7] : memref<8x64xf32, #tpu.memory_space<vmem>>, vector<8x64xf32>
    tpu.vector_store %arg4[%c0_6, %c0_7], %9 {strides = array<i32>} : memref<8x64xf32, #tpu.memory_space<vmem>>, vector<8x64xf32>,
    return
  }
  func.func @transform_0(%arg0: i32) -> (i32, i32) {
    %c0_i32 = arith.constant 0 : i32
    %c0_i32_0 = arith.constant 0 : i32
    return %arg0, %c0_i32 : i32, i32
  }
  func.func @transform_1(%arg0: i32) -> (i32, i32) {
    %c0_i32 = arith.constant 0 : i32
    %c0_i32_0 = arith.constant 0 : i32
    return %arg0, %c0_i32 : i32, i32
  }
  func.func @transform_2(%arg0: i32) -> (i32, i32) {
    %c0_i32 = arith.constant 0 : i32
    %c0_i32_0 = arith.constant 0 : i32
    return %arg0, %c0_i32 : i32, i32
  }
  func.func @transform_3(%arg0: i32) -> (i32, i32) {
    %c0_i32 = arith.constant 0 : i32
    %c0_i32_0 = arith.constant 0 : i32
    return %arg0, %c0_i32 : i32, i32
  }
}

</mosaic_0001>

<bundles_post_ra>
// kernel: tpu_custom_call.1
= control target key start
LH: loop header
LB: loop body
LE: loop exit
PB: predicated region body
PF: predicated region fallthrough
CT: control target
= control target key end

     0   :  { %8 = vsyncpa [#allocation3], 0  ;;  %s245_s0 = inlined_call_operand.hbm [shape: f32[8,64], index: 0, kind: input, shape index: {}]   ;;  %s246_s1 = inlined_call_operand.hbm [shape: f32[8,64], index: 1, kind: input, shape index: {}]   ;;  %s247_s2 = inlined_call_operand.hbm [shape: s32[8,64], index: 2, kind: input, shape index: {}]   ;;  %s248_s3 = inlined_call_operand.hbm [shape: f32[8,64], index: 3, kind: output, shape index: {}]  }
   0x1   :  { %9 = vsyncpa [#allocation6], 0 }
   0x2   :  { %10 = vsyncpa [#allocation4], 0  ;;  %s173_s12 = smov [#allocation5]   ;;  %s174_s14 = smov [#allocation2]  }
   0x3   :  { %s27_s13 = sshll.u32 %s173_s12, 4  ;;  %s17_s15 = sshll.u32 %s174_s14, 4  ;;  %s28_s13 = int_to_ptr.vmem [resolvable:$true] %s27_s13  ;;  %s18_s15 = int_to_ptr.vmem [resolvable:$true] %s17_s15 }
   0x4   :  { %s79_s18 = scalar_lea.hbm %s246_s1, 128 }
   0x5   :  { %p80_p0 = scmp.ne.s32.totalorder %s246_s1, %s79_s18  ;;  %p83_p1 = scmp.lt.u32.totalorder %s79_s18, %s246_s1 }
   0x7   :  { %p85_p2 = pnand %p83_p1, %p80_p0 }
   0x9   :  { %88 = shalt.err (!%p85_p2)
}
   0xa   :  { %s89_s23 = scalar_lea.vmem %s28_s13, 128  ;;  %p94_p4 = scmp.lt.s32.totalorder %s28_s13, %s28_s13 }
   0xb   :  { %p90_p3 = scmp.ne.s32.totalorder %s28_s13, %s89_s23  ;;  %p95_p5 = scmp.lt.s32.totalorder %s89_s23, %s89_s23 }
   0xd   :  { %p96_p6 = por %p95_p5, %p94_p4 }
   0xf   :  { %p97_p7 = pnand %p96_p6, %p90_p3 }
  0x11   :  { %100 = shalt.err (!%p97_p7)
}
  0x12   :  { %30 = dma.hbm_to_vmem [thread:$0]  %s246_s1, 128, %s28_s13, [#allocation6]  }
  0x13   :  { %s101_s28 = scalar_lea.hbm %s245_s0, 128 }
  0x14   :  { %p102_p8 = scmp.ne.s32.totalorder %s245_s0, %s101_s28  ;;  %p105_p9 = scmp.lt.u32.totalorder %s101_s28, %s245_s0 }
  0x16   :  { %p107_p10 = pnand %p105_p9, %p102_p8 }
  0x18   :  { %110 = shalt.err (!%p107_p10)
}
  0x19   :  { %s111_s6 = scalar_lea.vmem %s18_s15, 128  ;;  %p116_p12 = scmp.lt.s32.totalorder %s18_s15, %s18_s15 }
  0x1a   :  { %p112_p11 = scmp.ne.s32.totalorder %s18_s15, %s111_s6  ;;  %p117_p13 = scmp.lt.s32.totalorder %s111_s6, %s111_s6 }
  0x1c   :  { %p118_p0 = por %p117_p13, %p116_p12 }
  0x1e   :  { %p119_p1 = pnand %p118_p0, %p112_p11 }
  0x20   :  { %122 = shalt.err (!%p119_p1)
}
  0x21   :  { %20 = dma.hbm_to_vmem [thread:$0]  %s245_s0, 128, %s18_s15, [#allocation3]  }
  0x22   :  { %s175_s8 = smov [#allocation7]   ;;  %s123_s12 = scalar_lea.hbm %s247_s2, 128 }
  0x23   :  { %s37_s9 = sshll.u32 %s175_s8, 4  ;;  %p124_p2 = scmp.ne.s32.totalorder %s247_s2, %s123_s12  ;;  %s38_s9 = int_to_ptr.vmem [resolvable:$true] %s37_s9 }
  0x24   :  { %p127_p3 = scmp.lt.u32.totalorder %s123_s12, %s247_s2 }
  0x26   :  { %p129_p4 = pnand %p127_p3, %p124_p2 }
  0x28   :  { %132 = shalt.err (!%p129_p4)
}
  0x29   :  { %s133_s18 = scalar_lea.vmem %s38_s9, 128  ;;  %p138_p6 = scmp.lt.s32.totalorder %s38_s9, %s38_s9 }
  0x2a   :  { %p134_p5 = scmp.ne.s32.totalorder %s38_s9, %s133_s18  ;;  %p139_p7 = scmp.lt.s32.totalorder %s133_s18, %s133_s18 }
  0x2c   :  { %p140_p8 = por %p139_p7, %p138_p6 }
  0x2e   :  { %p141_p9 = pnand %p140_p8, %p134_p5 }
  0x30   :  { %144 = shalt.err (!%p141_p9)
}
  0x31   :  { %40 = dma.hbm_to_vmem [thread:$0]  %s247_s2, 128, %s38_s9, [#allocation6]  }
  0x32   :  { %167 = dma.done.wait [#allocation3], 128  }
  0x33   :  { %168 = vsyncadd [#allocation3], 4294967168 }
  0x34   :  { %169 = dma.done.wait [#allocation6], 256  }
  0x35   :  { %170 = vsyncadd [#allocation6], 4294967040  ;;  %v50_v0 = vld [vmem:[#allocation2] sm:$0xff]  ;;  %v51_v1 = vld [vmem:[#allocation5] sm:$0xff]  ;;  %s176_s19 = smov [#allocation8]   ;;  %vm57_vm1 = vcmask 523264  }
  0x36   :  { %v53_v2 = vld [vmem:[#allocation7] sm:$0xff]  ;;  %v52_v3 = vadd.f32 %v51_v1, %v50_v0  ;;  %s65_s20 = sshll.u32 %s176_s19, 4  ;;  %s66_s20 = int_to_ptr.vmem [resolvable:$true] %s65_s20 }
  0x37   :  { %vm54_vm0 = vcmp.ge.s32.totalorder %v53_v2, 214748365  ;;  %s145_s21 = scalar_lea.vmem %s66_s20, 128  ;;  %p150_p11 = scmp.lt.s32.totalorder %s66_s20, %s66_s20 }
  0x38   :  { %v55_v4 = vmul.f32 1.1111112, %v52_v3  ;;  %p146_p10 = scmp.ne.s32.totalorder %s66_s20, %s145_s21  ;;  %p151_p12 = scmp.lt.s32.totalorder %s145_s21, %s145_s21 }
  0x3a   :  { %v56_v5 = vsel %vm54_vm0, %v55_v4, 0.0  ;;  %p152_p13 = por %p151_p12, %p150_p11 }
  0x3b   :  { %58 = vst.msk [vmem:[#allocation8] sm:$0xff] %vm57_vm1, %v56_v5 }
  0x3c   :  { %p153_p0 = pnand %p152_p13, %p146_p10 }
  0x3e   :  { %156 = shalt.err (!%p153_p0)
}
  0x3f   :  { %s157_s23 = scalar_lea.hbm %s248_s3, 128 }
  0x40   :  { %p158_p1 = scmp.ne.s32.totalorder %s248_s3, %s157_s23  ;;  %p161_p2 = scmp.lt.u32.totalorder %s157_s23, %s248_s3 }
  0x42   :  { %p163_p3 = pnand %p161_p2, %p158_p1 }
  0x44   :  { %166 = shalt.err (!%p163_p3)
}
  0x45   :  { %68 = dma.vmem_to_hbm [thread:$0]  %s66_s20, 128, %s248_s3, [#allocation4]  }
  0x46   :  { %171 = dma.done.wait [#allocation4], 128  }
  0x47   :  { %172 = vsyncadd [#allocation4], 4294967168 }
  0x48   :  { %72 = vsyncpa [#allocation3], 1 }
  0x49   :  { %73 = vsyncpa [#allocation6], 1 }
  0x4a   :  { %74 = vsyncpa [#allocation4], 1 }

</bundles_post_ra>
